<compile_context>
chip_gen: v7x
topology: tpu7x:2x2x1
jax: 0.10.0
libtpu: 0.0.40
codegen_flags: <defaults>
</compile_context>

<pallas_src>
import jax
import jax.numpy as jnp
from jax import lax
from jax.experimental import pallas as pl
from jax.experimental.pallas import tpu as pltpu


def _one_hot_kernel(x_ref, o_ref):
    # x_ref: (1, 1, tH, W)  int32 labels for this (batch, spatial-tile)
    # o_ref: (1, tD, tH, W) float32 one-hot slab for this depth tile
    td = o_ref.shape[1]
    d_start = pl.program_id(2) * td          # depth-tile axis is always axis 2

    def write_class(d):
        # Scalar-vs-tile compare; labels are re-read from VMEM per class so no
        # large intermediate stays live across iterations.
        o_ref[0, d] = (x_ref[0, 0] == (d_start + d)).astype(o_ref.dtype)

    if td <= 32:                              # typical: td == depth -> static unroll
        for d in range(td):
            write_class(d)
    else:                                     # many classes per tile: rolled loop
        def body(d, carry):
            write_class(d)
            return carry
        lax.fori_loop(0, td, body, 0)


def _target_out_tile_bytes():
    """Generation-aware cap on the output tile size (float32 bytes)."""
    try:
        vmem = int(pltpu.get_tpu_info().vmem_capacity_bytes)
    except Exception:
        vmem = 64 << 20                       # conservative: v7x per-core VMEM
    # Worst case (tD == 1) the double-buffered label tile matches the output
    # tile, so 4 x tile must stay well inside the default ~32 MiB scoped VMEM
    # on every generation (v5e/v6e: 128 MiB phys -> 6 MiB tile; v7x: 4 MiB).
    return int(max(1 << 20, min(6 << 20, vmem // 16)))


def _choose_tiles(depth, H, W, target_bytes):
    """Pick (tD, tH) for an output block (1, tD, tH, W) of float32."""
    plane_bytes = H * W * 4
    if plane_bytes <= target_bytes:
        # Full (H, W) planes per depth slice (contiguous HBM writeback); stack
        # depth slices until the tile reaches ~target_bytes.
        tH = H
        tD = int(min(depth, max(1, target_bytes // plane_bytes), 128))
    else:
        # One depth slice is already big; tile H in multiples of 8 instead.
        tD = 1
        if H <= 8:
            tH = H                            # full-dim block is always legal
        else:
            rows = (target_bytes // (W * 4)) // 8 * 8
            tH = int(min(max(8, rows), H))    # multiple of 8 (sublane rule)
    return tD, tH


def one_hot_pallas(x_in, depth):
    """x_in: (B, 1, H, W) integer labels.  Returns (B, depth, H, W) float32."""
    if x_in.ndim != 4 or x_in.shape[1] != 1:
        raise ValueError(f"expected (B, 1, H, W) labels, got {x_in.shape}")
    B, _, H, W = x_in.shape
    x = x_in.astype(jnp.int32)                # labels stay in (B, 1, H, W)

    tD, tH = _choose_tiles(depth, H, W, _target_out_tile_bytes())
    n_d = pl.cdiv(depth, tD)
    n_h = pl.cdiv(H, tH)

    # Depth-tiles innermost (label DMA reused across depth tiles); the larger
    # of the batch / spatial-tile axes leads for balanced megacore sharding.
    if n_h >= B:
        grid = (n_h, B, n_d)
        in_map = lambda hj, b, dj: (b, 0, hj, 0)
        out_map = lambda hj, b, dj: (b, dj, hj, 0)
    else:
        grid = (B, n_h, n_d)
        in_map = lambda b, hj, dj: (b, 0, hj, 0)
        out_map = lambda b, hj, dj: (b, dj, hj, 0)

    return pl.pallas_call(
        _one_hot_kernel,
        out_shape=jax.ShapeDtypeStruct((B, depth, H, W), jnp.float32),
        grid_spec=pltpu.PrefetchScalarGridSpec(
            num_scalar_prefetch=0,
            grid=grid,
            in_specs=[pl.BlockSpec((1, 1, tH, W), in_map)],
            out_specs=pl.BlockSpec((1, tD, tH, W), out_map),
        ),
        compiler_params=pltpu.CompilerParams(
            dimension_semantics=("parallel", "parallel", "parallel"),
        ),
        cost_estimate=pl.CostEstimate(
            flops=B * depth * H * W,
            transcendentals=0,
            bytes_accessed=4 * B * H * W + 4 * B * depth * H * W,
        ),
    )(x)


if __name__ == "__main__":
    depth = 4
    B, H, W = 2, 16, 16

    key = jax.random.PRNGKey(0)
    # integer label map with a singleton channel dim, values in [0, depth)
    x_in = jax.random.randint(key, (B, 1, H, W), 0, depth, dtype=jnp.int32)

    out = one_hot_pallas(x_in, depth)
    out = jax.block_until_ready(out)

    # reference check (plain JAX): one_hot -> permute(0,-1,1,2,3) -> squeeze(2)
    ref = jnp.transpose(
        jax.nn.one_hot(jnp.squeeze(x_in, axis=1), depth, dtype=jnp.float32),
        (0, 3, 1, 2),
    )
    assert out.shape == (B, depth, H, W)
    assert out.dtype == jnp.float32
    assert bool(jnp.all(out == ref))

    print("KERNEL_OK")
</pallas_src>

<mosaic_0001>
module attributes {stable_mosaic.version = 11 : i64} {
  func.func @_one_hot_kernel(%arg0: i32, %arg1: i32, %arg2: i32, %arg3: memref<1x1x16x16xi32, #tpu.memory_space<vmem>>, %arg4: memref<1x4x16x16xf32, #tpu.memory_space<vmem>>) attributes {dimension_semantics = [#tpu.dimension_semantics<parallel>, #tpu.dimension_semantics<parallel>, #tpu.dimension_semantics<parallel>], iteration_bounds = array<i64: 2, 1, 1>, scalar_prefetch = 0 : i64, scratch_operands = 0 : i64, tpu.core_type = #tpu.core_type<tc>, window_params = [{transform_indices = @transform_0, window_bounds = array<i64: 1, 1, 16, 16>}, {transform_indices = @transform_1, window_bounds = array<i64: 1, 4, 16, 16>}]} {
    %c4_i32 = arith.constant 4 : i32
    %0 = arith.muli %arg2, %c4_i32 : i32
    %c0 = arith.constant 0 : index
    %c0_0 = arith.constant 0 : index
    %c0_1 = arith.constant 0 : index
    %c0_2 = arith.constant 0 : index
    %1 = vector.load %arg3[%c0, %c0_0, %c0_1, %c0_2] : memref<1x1x16x16xi32, #tpu.memory_space<vmem>>, vector<1x1x16x16xi32>
    %2 = vector.shape_cast %1 : vector<1x1x16x16xi32> to vector<16x16xi32>
    %c0_i32 = arith.constant 0 : i32
    %3 = arith.addi %0, %c0_i32 : i32
    %4 = vector.broadcast %3 : i32 to vector<16x16xi32>
    %5 = arith.cmpi eq, %2, %4 : vector<16x16xi32>
    %6 = arith.extui %5 : vector<16x16xi1> to vector<16x16xi32>
    %7 = arith.sitofp %6 : vector<16x16xi32> to vector<16x16xf32>
    %c0_3 = arith.constant 0 : index
    %c0_4 = arith.constant 0 : index
    %c0_5 = arith.constant 0 : index
    %c0_6 = arith.constant 0 : index
    %8 = vector.load %arg4[%c0_3, %c0_4, %c0_5, %c0_6] : memref<1x4x16x16xf32, #tpu.memory_space<vmem>>, vector<1x1x16x16xf32>
    %9 = vector.shape_cast %8 : vector<1x1x16x16xf32> to vector<16x16xf32>
    %10 = vector.shape_cast %7 : vector<16x16xf32> to vector<1x1x16x16xf32>
    tpu.vector_store %arg4[%c0_3, %c0_4, %c0_5, %c0_6], %10 {strides = array<i32>} : memref<1x4x16x16xf32, #tpu.memory_space<vmem>>, vector<1x1x16x16xf32>,
    %c0_7 = arith.constant 0 : index
    %c0_8 = arith.constant 0 : index
    %c0_9 = arith.constant 0 : index
    %c0_10 = arith.constant 0 : index
    %11 = vector.load %arg3[%c0_7, %c0_8, %c0_9, %c0_10] : memref<1x1x16x16xi32, #tpu.memory_space<vmem>>, vector<1x1x16x16xi32>
    %12 = vector.shape_cast %11 : vector<1x1x16x16xi32> to vector<16x16xi32>
    %c1_i32 = arith.constant 1 : i32
    %13 = arith.addi %0, %c1_i32 : i32
    %14 = vector.broadcast %13 : i32 to vector<16x16xi32>
    %15 = arith.cmpi eq, %12, %14 : vector<16x16xi32>
    %16 = arith.extui %15 : vector<16x16xi1> to vector<16x16xi32>
    %17 = arith.sitofp %16 : vector<16x16xi32> to vector<16x16xf32>
    %c0_11 = arith.constant 0 : index
    %c1 = arith.constant 1 : index
    %c0_12 = arith.constant 0 : index
    %c0_13 = arith.constant 0 : index
    %18 = vector.load %arg4[%c0_11, %c1, %c0_12, %c0_13] : memref<1x4x16x16xf32, #tpu.memory_space<vmem>>, vector<1x1x16x16xf32>
    %19 = vector.shape_cast %18 : vector<1x1x16x16xf32> to vector<16x16xf32>
    %20 = vector.shape_cast %17 : vector<16x16xf32> to vector<1x1x16x16xf32>
    tpu.vector_store %arg4[%c0_11, %c1, %c0_12, %c0_13], %20 {strides = array<i32>} : memref<1x4x16x16xf32, #tpu.memory_space<vmem>>, vector<1x1x16x16xf32>,
    %c0_14 = arith.constant 0 : index
    %c0_15 = arith.constant 0 : index
    %c0_16 = arith.constant 0 : index
    %c0_17 = arith.constant 0 : index
    %21 = vector.load %arg3[%c0_14, %c0_15, %c0_16, %c0_17] : memref<1x1x16x16xi32, #tpu.memory_space<vmem>>, vector<1x1x16x16xi32>
    %22 = vector.shape_cast %21 : vector<1x1x16x16xi32> to vector<16x16xi32>
    %c2_i32 = arith.constant 2 : i32
    %23 = arith.addi %0, %c2_i32 : i32
    %24 = vector.broadcast %23 : i32 to vector<16x16xi32>
    %25 = arith.cmpi eq, %22, %24 : vector<16x16xi32>
    %26 = arith.extui %25 : vector<16x16xi1> to vector<16x16xi32>
    %27 = arith.sitofp %26 : vector<16x16xi32> to vector<16x16xf32>
    %c0_18 = arith.constant 0 : index
    %c2 = arith.constant 2 : index
    %c0_19 = arith.constant 0 : index
    %c0_20 = arith.constant 0 : index
    %28 = vector.load %arg4[%c0_18, %c2, %c0_19, %c0_20] : memref<1x4x16x16xf32, #tpu.memory_space<vmem>>, vector<1x1x16x16xf32>
    %29 = vector.shape_cast %28 : vector<1x1x16x16xf32> to vector<16x16xf32>
    %30 = vector.shape_cast %27 : vector<16x16xf32> to vector<1x1x16x16xf32>
    tpu.vector_store %arg4[%c0_18, %c2, %c0_19, %c0_20], %30 {strides = array<i32>} : memref<1x4x16x16xf32, #tpu.memory_space<vmem>>, vector<1x1x16x16xf32>,
    %c0_21 = arith.constant 0 : index
    %c0_22 = arith.constant 0 : index
    %c0_23 = arith.constant 0 : index
    %c0_24 = arith.constant 0 : index
    %31 = vector.load %arg3[%c0_21, %c0_22, %c0_23, %c0_24] : memref<1x1x16x16xi32, #tpu.memory_space<vmem>>, vector<1x1x16x16xi32>
    %32 = vector.shape_cast %31 : vector<1x1x16x16xi32> to vector<16x16xi32>
    %c3_i32 = arith.constant 3 : i32
    %33 = arith.addi %0, %c3_i32 : i32
    %34 = vector.broadcast %33 : i32 to vector<16x16xi32>
    %35 = arith.cmpi eq, %32, %34 : vector<16x16xi32>
    %36 = arith.extui %35 : vector<16x16xi1> to vector<16x16xi32>
    %37 = arith.sitofp %36 : vector<16x16xi32> to vector<16x16xf32>
    %c0_25 = arith.constant 0 : index
    %c3 = arith.constant 3 : index
    %c0_26 = arith.constant 0 : index
    %c0_27 = arith.constant 0 : index
    %38 = vector.load %arg4[%c0_25, %c3, %c0_26, %c0_27] : memref<1x4x16x16xf32, #tpu.memory_space<vmem>>, vector<1x1x16x16xf32>
    %39 = vector.shape_cast %38 : vector<1x1x16x16xf32> to vector<16x16xf32>
    %40 = vector.shape_cast %37 : vector<16x16xf32> to vector<1x1x16x16xf32>
    tpu.vector_store %arg4[%c0_25, %c3, %c0_26, %c0_27], %40 {strides = array<i32>} : memref<1x4x16x16xf32, #tpu.memory_space<vmem>>, vector<1x1x16x16xf32>,
    return
  }
  func.func @transform_0(%arg0: i32, %arg1: i32, %arg2: i32) -> (i32, i32, i32, i32) {
    %c0_i32 = arith.constant 0 : i32
    %c0_i32_0 = arith.constant 0 : i32
    %c0_i32_1 = arith.constant 0 : i32
    return %arg0, %c0_i32, %arg1, %c0_i32_0 : i32, i32, i32, i32
  }
  func.func @transform_1(%arg0: i32, %arg1: i32, %arg2: i32) -> (i32, i32, i32, i32) {
    %c0_i32 = arith.constant 0 : i32
    %c0_i32_0 = arith.constant 0 : i32
    return %arg0, %arg2, %arg1, %c0_i32 : i32, i32, i32, i32
  }
}

</mosaic_0001>

<bundles_post_ra>
// kernel: tpu_custom_call.1
= control target key start
LH: loop header
LB: loop body
LE: loop exit
PB: predicated region body
PF: predicated region fallthrough
CT: control target
= control target key end

     0   :  { %6 = vsyncpa [#allocation3], 0  ;;  %s752_s0 = inlined_call_operand.hbm [shape: s32[2,1,16,16], index: 0, kind: input, shape index: {}]   ;;  %s753_s1 = inlined_call_operand.hbm [shape: f32[2,4,16,16], index: 1, kind: output, shape index: {}]  }
   0x1   :  { %8 = vsyncpa [#allocation3 + $0x1], 0 }
   0x2   :  { %9 = vsyncpa [#allocation4], 0 }
   0x3   :  { %11 = vsyncpa [#allocation4 + $0x1], 0  ;;  %s557_s6 = smov 0   ;;  %s559_s7 = smov 0  }
   0x4   :  { %s561_s8 = smov 0   ;;  %s563_s9 = smov 0  }
   0x5   :  { %s565_s10 = smov 0   ;;  %s567_s11 = smov 0  }
   0x6 LB: > { %s328_s12 = sadd.s32 4294967295, %s538_s11   ;;  %s329_s13 = sadd.s32 4294967294, %s538_s11   ;;  %s538_s11 = sphi %s567_s11, %s17_s11   ;;  %s534_s10 = sphi %s565_s10, %s768_s10   ;;  %s530_s9 = sphi %s563_s9, %s767_s9   ;;  %s526_s8 = sphi %s561_s8, %s766_s8   ;;  %s522_s7 = sphi %s559_s7, %s765_s7   ;;  %s518_s6 = sphi %s557_s6, %s764_s6  }
   0x7   : > { %s36_s14 = sadd.s32 1, %s534_s10  ;;  %s45_s15 = sadd.s32 1, %s526_s8 }
   0x8   : > { %p38_p0 = scmp.ge.s32.totalorder %s36_s14, 2  ;;  %p52_p1 = scmp.ne.s32.totalorder %s526_s8, %s522_s7 }
   0x9   : > { %p53_p2 = scmp.eq.s32.totalorder %s538_s11, 0  ;;  %p58_p3 = scmp.ne.s32.totalorder %s522_s7, %s518_s6 }
   0xa   : > { %s770_s14 = smov (%p38_p0, %s36_s14), 0  ;;  %p59_p5 = scmp.eq.s32.totalorder %s328_s12, 0 }
   0xb   : > { %p598_p4 = por %p53_p2, %p52_p1  ;;  %s40_s17 = ssub.s32 %s534_s10, %s770_s14 }
   0xc   : > { %p86_p6 = scmp.eq.s32.totalorder %s328_s12, 1  ;;  %p43_p7 = scmp.eq.s32.totalorder %s40_s17, 0 }
   0xd   : > { %p604_p8 = por %p59_p5, %p58_p3  ;;  %p92_p10 = scmp.eq.s32.totalorder %s329_s13, 1 }
   0xe   : > { %p608_p9 = por %p86_p6, %p52_p1  ;;  %p371_p13 = scmp.lt.s32.totalorder %s538_s11, 2 }
   0xf   : > { %s613_s20 = scalar_select %p43_p7, %s526_s8, %s45_s15  }
  0x10   : > { %s757_s19 = scalar_select %p608_p9, 1, 0 }
  0x11   : > { %p615_p11 = por %p92_p10, %p58_p3  ;;  %s112_s22 = sand.u32 1, %s526_s8  }
  0x12   : > { %s332_s23 = sshll.u32 %s112_s22, 4  ;;  %s357_s24 = sshll.u32 %s534_s10, 8 }
  0x13   : > { %s758_s21 = scalar_select %p615_p11, 1, 0 }
  0x14   : > { %s626_s27 = scalar_lea.hbm %s752_s0, %s357_s24  ;;  %s116_s28 = scalar_lea.vmem [#allocation2], %s332_s23 }
  0x15   : > { %s125_s29 = sshll.u32 %s116_s28, 4  ;;  %p632_p0 = pnand %p371_p13, %p598_p4  ;;  %s628_s29 = int_to_ptr.vmem [resolvable:$true] %s125_s29 }
  0x16   : > { %s637_s2 = scalar_lea.sflag [#allocation3], %s112_s22  ;;  %s426_s3 = scalar_lea.hbm %s626_s27, 256 }
  0x17   : > { %p427_p2 = scmp.ne.s32.totalorder %s626_s27, %s426_s3  ;;  %p428_p3 = pneg %p632_p0 }
  0x18   : > { %s431_s12 = scalar_lea.hbm %s752_s0, 512  ;;  %p432_p4 = scmp.lt.u32.totalorder %s626_s27, %s752_s0 }
  0x19   : > { %p429_p5 = pnand %p428_p3, %p427_p2  ;;  %p433_p7 = scmp.lt.u32.totalorder %s431_s12, %s426_s3 }
  0x1a   : > { %p435_p13 = scmp.lt.u32.totalorder %s426_s3, %s626_s27 }
  0x1b   : > { %p430_p6 = pneg %p429_p5  ;;  %p434_p10 = por %p433_p7, %p432_p4 }
  0x1d   : > { %p436_p12 = por %p435_p13, %p434_p10 }
  0x1f   : > { %p437_p1 = pnand %p436_p12, %p430_p6 }
  0x21   : > { %440 = shalt.err (!%p437_p1)
}
  0x22   : > { %s441_s16 = scalar_lea.vmem %s628_s29, 256  ;;  %s540_s17 = smov [#allocation2]  }
  0x23   : > { %p442_p2 = scmp.ne.s32.totalorder %s628_s29, %s441_s16  ;;  %s446_s22 = sshll.u32 %s540_s17, 4  ;;  %s447_s22 = int_to_ptr.vmem [resolvable:$false] %s446_s22 }
  0x24   : > { %s448_s23 = scalar_lea.vmem %s447_s22, 512  ;;  %p449_p9 = scmp.lt.s32.totalorder %s628_s29, %s447_s22 }
  0x25   : > { %p444_p5 = pnand %p442_p2, %p428_p3  ;;  %p450_p4 = scmp.lt.s32.totalorder %s448_s23, %s441_s16 }
  0x27   : > { %p445_p11 = pneg %p444_p5  ;;  %p451_p7 = por %p450_p4, %p449_p9 }
  0x29   : > { %p452_p10 = pnand %p451_p7, %p445_p11 }
  0x2b   : > { %455 = shalt.err (!%p452_p10)
}
  0x2c   : > { %s541_s24 = smov 128   ;;  %s542_s25 = smov 8  }
  0x2d   : > { %366 = dma.hbm_to_vmem [thread:$0]  (!%p632_p0), %s626_s27, 256, %s628_s29, %s637_s2, %s541_s24, %s541_s24, %s542_s25  }
  0x2e   : > { %p133_p12 = scmp.lt.s32.totalorder %s538_s11, 3  ;;  %p760_p1 = scmp.ge.s32.totalorder %s538_s11, 1 }
  0x30   : > { %p134_p3 = pnand %p760_p1, %p133_p12 }
  0x31   : > { %s669_s26 = sand.u32 (!%p134_p3), 1, %s522_s7  }
  0x32   : > { %137 = sbr.rel (%p134_p3) target bundleno = 86 (0x56), region = 24  ;;  %s336_s28 = sshll.u32 (!%p134_p3), %s669_s26, 4 }
  0x33   : > { %s140_s3 = scalar_lea.sflag (!%p134_p3), [#allocation3], %s669_s26  ;;  %s143_s4 = scalar_lea.vmem (!%p134_p3), [#allocation2], %s336_s28 }
  0x39   : > { %509 = dma.done.wait (%p604_p8), %s140_s3, 256  }
  0x3a   : > { %511 = vsyncadd (%p604_p8), %s140_s3, 4294967040  ;;  %s337_s27 = sshll.u32 %s669_s26, 6  ;;  %s358_s2 = sshll.u32 %s530_s9, 10  ;;  %v166_v0 = vld [vmem:[%s143_s4] sm:$0xff]  ;;  %vm175_vm0 = vcmask 130048   ;;  %v167_v1 = vld [vmem:[%s143_s4 + $0x8] sm:$0xff] }
  0x3b   : > { %s678_s29 = scalar_lea.vmem [#allocation5], %s337_s27  ;;  %vm169_vm1 = vcmp.eq.s32.totalorder %v166_v0, 0  ;;  %vm170_vm2 = vcmp.eq.s32.totalorder %v167_v1, 0  ;;  %vm182_vm3 = vcmp.eq.s32.totalorder %v166_v0, 1  ;;  %vm183_vm4 = vcmp.eq.s32.totalorder %v167_v1, 1  ;;  %s687_s5 = scalar_lea.hbm %s753_s1, %s358_s2 }
  0x3c   : > { %s236_s30 = sshll.u32 %s678_s29, 4  ;;  %v543_v2 = vmov 0.0   ;;  %vm195_vm5 = vcmp.eq.s32.totalorder %v166_v0, 2  ;;  %vm196_vm6 = vcmp.eq.s32.totalorder %v167_v1, 2  ;;  %vm208_vm7 = vcmp.eq.s32.totalorder %v166_v0, 3  ;;  %s218_s12 = scalar_lea.sflag [#allocation4], %s669_s26  ;;  %s682_s30 = int_to_ptr.vmem [resolvable:$true] %s236_s30 }
  0x3d   : > { %v338_v3 = vsel %vm169_vm1, 1.0, %v543_v2  ;;  %v339_v4 = vsel %vm170_vm2, 1.0, %v543_v2  ;;  %v340_v5 = vsel %vm182_vm3, 1.0, %v543_v2  ;;  %v341_v6 = vsel %vm183_vm4, 1.0, %v543_v2  ;;  %s456_s13 = scalar_lea.vmem %s682_s30, 1024  ;;  %p761_p9 = scmp.ne.s32.totalorder %s757_s19, 0 }
  0x3e   : > { %176 = vst.msk [vmem:[%s678_s29] sm:$0xff] %vm175_vm0, %v338_v3  ;;  %177 = vst.msk [vmem:[%s678_s29 + $0x8] sm:$0xff] %vm175_vm0, %v339_v4  ;;  %vm209_vm8 = vcmp.eq.s32.totalorder %v167_v1, 3  ;;  %v344_v7 = vsel %vm195_vm5, 1.0, %v543_v2  ;;  %v345_v8 = vsel %vm196_vm6, 1.0, %v543_v2  ;;  %v348_v9 = vsel %vm208_vm7, 1.0, %v543_v2  ;;  %p457_p8 = scmp.ne.s32.totalorder %s682_s30, %s456_s13 }
  0x3f   : > { %342 = vst.msk [vmem:[%s678_s29 + $0x10] sm:$0xff] %vm175_vm0, %v340_v5  ;;  %343 = vst.msk [vmem:[%s678_s29 + $0x18] sm:$0xff] %vm175_vm0, %v341_v6  ;;  %v349_v10 = vsel %vm209_vm8, 1.0, %v543_v2  ;;  %s544_s15 = smov [#allocation5]  }
  0x40   : > { %346 = vst.msk [vmem:[%s678_s29 + $0x20] sm:$0xff] %vm175_vm0, %v344_v7  ;;  %347 = vst.msk [vmem:[%s678_s29 + $0x28] sm:$0xff] %vm175_vm0, %v345_v8  ;;  %p458_p11 = pnand %p457_p8, %p761_p9  ;;  %s460_s16 = sshll.u32 %s544_s15, 4  ;;  %s461_s16 = int_to_ptr.vmem [resolvable:$false] %s460_s16 }
  0x41   : > { %350 = vst.msk [vmem:[%s678_s29 + $0x30] sm:$0xff] %vm175_vm0, %v348_v9  ;;  %351 = vst.msk [vmem:[%s678_s29 + $0x38] sm:$0xff] %vm175_vm0, %v349_v10  ;;  %s462_s17 = scalar_lea.vmem %s461_s16, 2048  ;;  %p463_p6 = scmp.lt.s32.totalorder %s682_s30, %s461_s16 }
  0x42   : > { %p459_p0 = pneg %p458_p11  ;;  %p464_p13 = scmp.lt.s32.totalorder %s462_s17, %s456_s13 }
  0x44   : > { %p465_p2 = por %p464_p13, %p463_p6 }
  0x46   : > { %p466_p5 = pnand %p465_p2, %p459_p0 }
  0x48   : > { %469 = shalt.err (!%p466_p5)
}
  0x49   : > { %s470_s22 = scalar_lea.hbm %s687_s5, 1024  ;;  %s474_s25 = scalar_lea.hbm %s753_s1, 2048 }
  0x4a   : > { %p471_p4 = scmp.ne.s32.totalorder %s687_s5, %s470_s22  ;;  %p475_p12 = scmp.lt.u32.totalorder %s687_s5, %s753_s1 }
  0x4b   : > { %p476_p1 = scmp.lt.u32.totalorder %s474_s25, %s470_s22  ;;  %p478_p8 = scmp.lt.u32.totalorder %s470_s22, %s687_s5 }
  0x4c   : > { %p472_p7 = pnand %p471_p4, %p761_p9 }
  0x4d   : > { %p477_p3 = por %p476_p1, %p475_p12 }
  0x4e   : > { %p473_p10 = pneg %p472_p7 }
  0x4f   : > { %p479_p11 = por %p478_p8, %p477_p3 }
  0x51   : > { %p480_p0 = pnand %p479_p11, %p473_p10 }
  0x53   : > { %483 = shalt.err (!%p480_p0)
}
  0x54   : > { %s545_s4 = smov 128   ;;  %s546_s27 = smov 8  }
  0x55   : > { %361 = dma.vmem_to_hbm [thread:$0]  (%p761_p9), %s682_s30, 1024, %s687_s5, %s218_s12, %s545_s4, %s545_s4, %s546_s27  }
  0x56 PF: > { %s251_s29 = sand.u32 1, %s518_s6   ;;  %p762_p6 = scmp.ne.s32.totalorder %s758_s21, 0 }
  0x57   : > { %p763_p13 = scmp.ge.s32.totalorder %s538_s11, 2  ;;  %s252_s2 = scalar_lea.sflag [#allocation4], %s251_s29 }
  0x59   : > { %p368_p2 = pnand %p763_p13, %p762_p6 }
  0x5b   : > { %513 = dma.done.wait (!%p368_p2), %s252_s2, 1024  }
  0x5c   : > { %515 = vsyncadd (!%p368_p2), %s252_s2, 4294966272  ;;  %s17_s11 = sadd.s32 1, %s538_s11   ;;  %s764_s6 = smov %s522_s7 }
  0x5d   : > { %p14_p5 = scmp.ge.s32.totalorder %s17_s11, 4   ;;  %s765_s7 = smov %s526_s8 }
  0x5e   : > { %s766_s8 = smov %s613_s20  ;;  %s767_s9 = smov %s534_s10 }
  0x5f   : > { %s768_s10 = smov %s770_s14  ;;  %16 = sbr.rel (!%p14_p5) target bundleno = 6 (0x6), region = 72 }
  0x66   :  { %257 = vsyncpa [#allocation3], 1 }
  0x67   :  { %259 = vsyncpa [#allocation3 + $0x1], 1 }
  0x68   :  { %260 = vsyncpa [#allocation4], 1 }
  0x69   :  { %262 = vsyncpa [#allocation4 + $0x1], 1 }

</bundles_post_ra>
